<compile_context>
chip_gen: v5e
topology: v5e:2x2
jax: 0.10.0
libtpu: 0.0.40
codegen_flags: <defaults>
</compile_context>

<pallas_src>
import jax
import jax.numpy as jnp
from jax import lax
from jax.experimental import pallas as pl
from jax.experimental.pallas import tpu as pltpu


_BLOCK_BUDGET = 7 << 20           # ~7 MiB of (x + out) bytes per grid block
_V5E_DEFAULT_SCOPED_VMEM = 16 << 20
_MAX_BT = 16                      # bound the in-kernel batch loop


def _round_up(n, m):
    return ((n + m - 1) // m) * m


def _physical_vmem_bytes():
    try:
        return int(pltpu.get_tpu_info().vmem_capacity_bytes)
    except Exception:
        return 64 << 20           # conservative fallback: v7x per-TensorCore VMEM


def _choose_tiling(B, S, D_pad, K, itemsize):
    """Pick (Bt, tS, tD, S_pad). tD is always a multiple of 128 (D_pad is)."""
    td_cands = sorted(
        {D_pad} | {c for c in (2048, 1024, 512, 256, 128) if D_pad % c == 0},
        reverse=True)
    for tD in td_cands:
        row = (S * tD + K * tD) * itemsize           # one batch row: x + out bytes
        if row <= _BLOCK_BUDGET:
            Bt = 1
            for bt in range(min(B, _MAX_BT), 0, -1):
                if B % bt == 0 and bt * row <= _BLOCK_BUDGET:
                    Bt = bt
                    break
            return Bt, S, tD, S
    # Even a single (1, S, 128) x-block exceeds the budget: split the S reduction.
    tD = 128
    max_ts = _BLOCK_BUDGET // (tD * itemsize) - K
    tS = max(128, (max_ts // 128) * 128)
    S_pad = _round_up(S, tS)
    return 1, tS, tD, S_pad


def _linear_map_kernel(x_ref, w_ref, b_ref, o_ref, acc_ref):
    # x_ref: (Bt, tS, tD)  w_ref: (K, tS)  b_ref: (K, 1)
    # o_ref: (Bt, K, tD)   acc_ref: (Bt, K, tD) f32 scratch (persists across grid)
    si = pl.program_id(2)

    @pl.when(si == 0)
    def _():
        acc_ref[...] = jnp.zeros_like(acc_ref)

    w = w_ref[...]                                    # keep native dtype -> MXU

    def body(i, carry):
        acc_ref[i] += jnp.dot(w, x_ref[i], preferred_element_type=jnp.float32)
        return carry

    lax.fori_loop(0, x_ref.shape[0], body, None, unroll=True)

    @pl.when(si == pl.num_programs(2) - 1)
    def _():
        # Bias add hoisted out of the batch loop: one broadcast+add per block.
        bias = b_ref[...].astype(jnp.float32)[None, :, :]      # (1, K, 1)
        o_ref[...] = (acc_ref[...] + bias).astype(o_ref.dtype)


def linear_map(x, w, b):
    """x: (B, S, D); w: (K, S); b: (K,).  Returns (B, K, D) in x.dtype."""
    B, S, D = x.shape
    K = w.shape[0]
    assert w.shape == (K, S) and b.shape == (K,)

    itemsize = jnp.dtype(x.dtype).itemsize
    D_pad = _round_up(D, 128)
    Bt, tS, tD, S_pad = _choose_tiling(B, S, D_pad, K, itemsize)

    # Guarantee >= 2 steps along a "parallel" axis for small problems (v7x: 2 TCs).
    if (B // Bt) * (D_pad // tD) == 1:
        if B >= 2:
            Bt = 1
        elif tD % 256 == 0:
            tD //= 2

    # Wrapper-side zero padding: D to a lane-dense multiple of 128; S only when
    # the reduction axis is split (zero rows/cols contribute nothing to the sum).
    if D_pad != D:
        x = jnp.pad(x, ((0, 0), (0, 0), (0, D_pad - D)))
    if S_pad != S:
        x = jnp.pad(x, ((0, 0), (0, S_pad - S), (0, 0)))
        w = jnp.pad(w, ((0, 0), (0, S_pad - S)))
    b2 = b.reshape(K, 1)

    grid = (B // Bt, D_pad // tD, S_pad // tS)

    x_blk = Bt * tS * tD * itemsize
    o_blk = Bt * K * tD * itemsize
    w_blk = K * tS * jnp.dtype(w.dtype).itemsize
    acc_blk = Bt * K * tD * 4
    needed = 2 * (x_blk + o_blk + w_blk) + acc_blk + (2 << 20)

    params = {"dimension_semantics": ("parallel", "parallel", "arbitrary")}
    if needed > _V5E_DEFAULT_SCOPED_VMEM:
        # Never request more than ~0.75x physical VMEM of this generation.
        params["vmem_limit_bytes"] = int(
            min(needed, (_physical_vmem_bytes() * 3) // 4))

    cost = pl.CostEstimate(
        flops=2 * B * K * S_pad * D_pad,
        transcendentals=0,
        bytes_accessed=(B * S_pad * D_pad + B * K * D_pad) * itemsize
        + K * S_pad * jnp.dtype(w.dtype).itemsize
        + K * jnp.dtype(b.dtype).itemsize,
    )

    out = pl.pallas_call(
        _linear_map_kernel,
        out_shape=jax.ShapeDtypeStruct((B, K, D_pad), x.dtype),
        grid_spec=pltpu.PrefetchScalarGridSpec(
            num_scalar_prefetch=0,
            grid=grid,
            in_specs=[
                pl.BlockSpec((Bt, tS, tD), lambda bi, di, si: (bi, si, di)),  # x
                pl.BlockSpec((K, tS), lambda bi, di, si: (0, si)),            # W (resident)
                pl.BlockSpec((K, 1), lambda bi, di, si: (0, 0)),              # bias
            ],
            out_specs=pl.BlockSpec((Bt, K, tD), lambda bi, di, si: (bi, 0, di)),
            scratch_shapes=[pltpu.VMEM((Bt, K, tD), jnp.float32)],
        ),
        compiler_params=pltpu.CompilerParams(**params),
        cost_estimate=cost,
    )(x, w, b2)

    if D_pad != D:
        out = out[:, :, :D]
    return out


def _reference(x, w, b):
    # transpose(1,2) -> Linear(S -> K) -> transpose(1,2)
    return jnp.einsum("ks,bsd->bkd", w, x) + b[None, :, None]


if __name__ == "__main__":
    key = jax.random.PRNGKey(0)
    k_x, k_w, k_b = jax.random.split(key, 3)

    B, S, D, K = 2, 8, 32, 4       # batch, seq_len, hidden, k_heads
    x = jax.random.normal(k_x, (B, S, D), dtype=jnp.float32)

    # Deterministic parameter init (xavier_normal-style std for the (K, S) weight).
    std = (2.0 / (S + K)) ** 0.5
    w = jax.random.normal(k_w, (K, S), dtype=jnp.float32) * std
    b = jax.random.normal(k_b, (K,), dtype=jnp.float32) * 0.02

    out = jax.block_until_ready(linear_map(x, w, b))
    ref = _reference(x, w, b)

    assert out.shape == (B, K, D)
    assert jnp.allclose(out, ref, atol=1e-5, rtol=1e-5), "mismatch vs reference"
    print("KERNEL_OK")
</pallas_src>

<mosaic_0001>
module attributes {stable_mosaic.version = 11 : i64} {
  func.func @_linear_map_kernel(%arg0: i32, %arg1: i32, %arg2: i32, %arg3: memref<1x8x128xf32, #tpu.memory_space<vmem>>, %arg4: memref<4x8xf32, #tpu.memory_space<vmem>>, %arg5: memref<4x1xf32, #tpu.memory_space<vmem>>, %arg6: memref<1x4x128xf32, #tpu.memory_space<vmem>>, %arg7: memref<1x4x128xf32, #tpu.memory_space<vmem>>) attributes {dimension_semantics = [#tpu.dimension_semantics<parallel>, #tpu.dimension_semantics<parallel>, #tpu.dimension_semantics<arbitrary>], iteration_bounds = array<i64: 2, 1, 1>, scalar_prefetch = 0 : i64, scratch_operands = 1 : i64, tpu.core_type = #tpu.core_type<tc>, window_params = [{transform_indices = @transform_0, window_bounds = array<i64: 1, 8, 128>}, {transform_indices = @transform_1, window_bounds = array<i64: 4, 8>}, {pipeline_mode = #tpu.pipeline_mode<synchronous>, transform_indices = @transform_2, window_bounds = array<i64: 4, 1>}, {transform_indices = @transform_3, window_bounds = array<i64: 1, 4, 128>}]} {
    %c0_i32 = arith.constant 0 : i32
    %0 = arith.cmpi eq, %arg2, %c0_i32 : i32
    %1 = arith.extui %0 : i1 to i32
    %c0_i32_0 = arith.constant 0 : i32
    %2 = arith.cmpi ne, %1, %c0_i32_0 : i32
    scf.if %2 {
      %cst_11 = arith.constant 0.000000e+00 : f32
      %19 = vector.broadcast %cst_11 : f32 to vector<1x4x128xf32>
      %c0_12 = arith.constant 0 : index
      %c0_13 = arith.constant 0 : index
      %c0_14 = arith.constant 0 : index
      %20 = vector.load %arg7[%c0_12, %c0_13, %c0_14] : memref<1x4x128xf32, #tpu.memory_space<vmem>>, vector<1x4x128xf32>
      tpu.vector_store %arg7[%c0_12, %c0_13, %c0_14], %19 {strides = array<i32>} : memref<1x4x128xf32, #tpu.memory_space<vmem>>, vector<1x4x128xf32>,
    } else {
    }
    %c0 = arith.constant 0 : index
    %c0_1 = arith.constant 0 : index
    %3 = vector.load %arg4[%c0, %c0_1] : memref<4x8xf32, #tpu.memory_space<vmem>>, vector<4x8xf32>
    %c0_i32_2 = arith.constant 0 : i32
    %4 = arith.index_cast %c0_i32_2 : i32 to index
    %c0_3 = arith.constant 0 : index
    %c0_4 = arith.constant 0 : index
    %5 = vector.load %arg7[%4, %c0_3, %c0_4] : memref<1x4x128xf32, #tpu.memory_space<vmem>>, vector<1x4x128xf32>
    %6 = vector.shape_cast %5 : vector<1x4x128xf32> to vector<4x128xf32>
    %7 = arith.index_cast %c0_i32_2 : i32 to index
    %c0_5 = arith.constant 0 : index
    %c0_6 = arith.constant 0 : index
    %8 = vector.load %arg3[%7, %c0_5, %c0_6] : memref<1x8x128xf32, #tpu.memory_space<vmem>>, vector<1x8x128xf32>
    %9 = vector.shape_cast %8 : vector<1x8x128xf32> to vector<8x128xf32>
    %cst = arith.constant dense<0.000000e+00> : vector<4x128xf32>
    %10 = tpu.matmul %3, %9, %cst {dimension_numbers = #tpu.dot_dimension_numbers<[1], [0], [0], [1], [0, 0, 1, 1], [], []>} : vector<4x8xf32>, vector<8x128xf32>, vector<4x128xf32> -> vector<4x128xf32>
    %11 = arith.addf %6, %10 : vector<4x128xf32>
    %12 = arith.index_cast %c0_i32_2 : i32 to index
    %c0_7 = arith.constant 0 : index
    %c0_8 = arith.constant 0 : index
    %13 = vector.load %arg7[%12, %c0_7, %c0_8] : memref<1x4x128xf32, #tpu.memory_space<vmem>>, vector<1x4x128xf32>
    %14 = vector.shape_cast %13 : vector<1x4x128xf32> to vector<4x128xf32>
    %15 = vector.shape_cast %11 : vector<4x128xf32> to vector<1x4x128xf32>
    tpu.vector_store %arg7[%12, %c0_7, %c0_8], %15 {strides = array<i32>} : memref<1x4x128xf32, #tpu.memory_space<vmem>>, vector<1x4x128xf32>,
    %c1_i32 = arith.constant 1 : i32
    %c0_i32_9 = arith.constant 0 : i32
    %16 = arith.cmpi eq, %arg2, %c0_i32_9 : i32
    %17 = arith.extui %16 : i1 to i32
    %c0_i32_10 = arith.constant 0 : i32
    %18 = arith.cmpi ne, %17, %c0_i32_10 : i32
    scf.if %18 {
      %c0_11 = arith.constant 0 : index
      %c0_12 = arith.constant 0 : index
      %19 = vector.load %arg5[%c0_11, %c0_12] : memref<4x1xf32, #tpu.memory_space<vmem>>, vector<4x1xf32>
      %20 = vector.shape_cast %19 : vector<4x1xf32> to vector<1x4x1xf32>
      %c0_13 = arith.constant 0 : index
      %c0_14 = arith.constant 0 : index
      %c0_15 = arith.constant 0 : index
      %21 = vector.load %arg7[%c0_13, %c0_14, %c0_15] : memref<1x4x128xf32, #tpu.memory_space<vmem>>, vector<1x4x128xf32>
      %22 = vector.broadcast %20 : vector<1x4x1xf32> to vector<1x4x128xf32>
      %23 = arith.addf %21, %22 : vector<1x4x128xf32>
      %c0_16 = arith.constant 0 : index
      %c0_17 = arith.constant 0 : index
      %c0_18 = arith.constant 0 : index
      %24 = vector.load %arg6[%c0_16, %c0_17, %c0_18] : memref<1x4x128xf32, #tpu.memory_space<vmem>>, vector<1x4x128xf32>
      tpu.vector_store %arg6[%c0_16, %c0_17, %c0_18], %23 {strides = array<i32>} : memref<1x4x128xf32, #tpu.memory_space<vmem>>, vector<1x4x128xf32>,
    } else {
    }
    return
  }
  func.func @transform_0(%arg0: i32, %arg1: i32, %arg2: i32) -> (i32, i32, i32) {
    %c0_i32 = arith.constant 0 : i32
    return %arg0, %arg2, %arg1 : i32, i32, i32
  }
  func.func @transform_1(%arg0: i32, %arg1: i32, %arg2: i32) -> (i32, i32) {
    %c0_i32 = arith.constant 0 : i32
    %c0_i32_0 = arith.constant 0 : i32
    return %c0_i32, %arg2 : i32, i32
  }
  func.func @transform_2(%arg0: i32, %arg1: i32, %arg2: i32) -> (i32, i32) {
    %c0_i32 = arith.constant 0 : i32
    %c0_i32_0 = arith.constant 0 : i32
    %c0_i32_1 = arith.constant 0 : i32
    return %c0_i32, %c0_i32_0 : i32, i32
  }
  func.func @transform_3(%arg0: i32, %arg1: i32, %arg2: i32) -> (i32, i32, i32) {
    %c0_i32 = arith.constant 0 : i32
    %c0_i32_0 = arith.constant 0 : i32
    return %arg0, %c0_i32, %arg1 : i32, i32, i32
  }
}

</mosaic_0001>

<bundles_post_ra>
// kernel: tpu_custom_call.1
= control target key start
LH: loop header
LB: loop body
LE: loop exit
PB: predicated region body
PF: predicated region fallthrough
CT: control target
= control target key end

     0   :  { %8 = vsyncpa [#allocation4], 0  ;;  %s737_s0 = inlined_call_operand.hbm [shape: f32[2,8,128], index: 0, kind: input, shape index: {}]   ;;  %s738_s1 = inlined_call_operand.vmem [shape: f32[4,8], index: 1, kind: input, shape index: {}]   ;;  %s739_s2 = inlined_call_operand.vmem [shape: f32[4,1], index: 2, kind: input, shape index: {}]   ;;  %s740_s3 = inlined_call_operand.hbm [shape: f32[2,4,128], index: 3, kind: output, shape index: {}]  }
   0x1   :  { %10 = vsyncpa [#allocation4 + $0x1], 0 }
   0x2   :  { %11 = vsyncpa [#allocation5], 0 }
   0x3   :  { %13 = vsyncpa [#allocation5 + $0x1], 0  ;;  %s610_s12 = smov 0   ;;  %s612_s13 = smov 0  }
   0x4   :  { %s614_s14 = smov 0   ;;  %s616_s15 = smov 0  }
   0x5   :  { %s618_s16 = smov 0   ;;  %s620_s17 = smov 0  }
   0x6 LB: > { %s394_s18 = sadd.s32 4294967295, %s586_s17   ;;  %s395_s19 = sadd.s32 4294967294, %s586_s17   ;;  %s586_s17 = sphi %s620_s17, %s19_s17   ;;  %s582_s16 = sphi %s618_s16, %s749_s16   ;;  %s578_s15 = sphi %s616_s15, %s748_s15   ;;  %s574_s14 = sphi %s614_s14, %s747_s14   ;;  %s570_s13 = sphi %s612_s13, %s746_s13   ;;  %s566_s12 = sphi %s610_s12, %s745_s12  }
   0x7   : > { %s38_s20 = sadd.s32 1, %s582_s16  ;;  %s49_s21 = sadd.s32 1, %s574_s14 }
   0x8   : > { %p40_p0 = scmp.ge.s32.totalorder %s38_s20, 2  ;;  %p56_p1 = scmp.ne.s32.totalorder %s574_s14, %s570_s13 }
   0x9   : > { %p57_p2 = scmp.eq.s32.totalorder %s586_s17, 0  ;;  %p62_p3 = scmp.ne.s32.totalorder %s570_s13, %s566_s12 }
   0xa   : > { %s751_s20 = smov (%p40_p0, %s38_s20), 0  ;;  %p63_p5 = scmp.eq.s32.totalorder %s394_s18, 0 }
   0xb   : > { %p651_p4 = por %p57_p2, %p56_p1  ;;  %s42_s23 = ssub.s32 %s582_s16, %s751_s20 }
   0xc   : > { %p135_p6 = scmp.eq.s32.totalorder %s394_s18, 1  ;;  %p47_p7 = scmp.eq.s32.totalorder %s42_s23, 0 }
   0xd   : > { %p657_p8 = por %p63_p5, %p62_p3  ;;  %p141_p10 = scmp.eq.s32.totalorder %s395_s19, 1 }
   0xe   : > { %p661_p9 = por %p135_p6, %p56_p1  ;;  %p398_p12 = scmp.ge.s32.totalorder %s586_s17, 2 }
   0xf   : > { %s666_s26 = scalar_select %p47_p7, %s574_s14, %s49_s21  }
  0x10   : > { %p668_p11 = por %p141_p10, %p62_p3  ;;  %p421_p13 = scmp.lt.s32.totalorder %s586_s17, 2 }
  0x11   : > { %s171_s28 = sand.u32 1, %s574_s14   ;;  %s400_s30 = sshll.u32 %s582_s16, 3 }
  0x12   : > { %s399_s29 = sshll.u32 %s171_s28, 3  ;;  %s181_s6 = scalar_lea.hbm %s737_s0, %s400_s30 }
  0x13   : > { %s175_s7 = scalar_lea.vmem [#allocation3], %s399_s29  ;;  %s183_s9 = sshll.u32 %s181_s6, 4  ;;  %s184_s9 = int_to_ptr.hbm [resolvable:$true] %s183_s9 }
  0x14   : > { %s185_s8 = sshll.u32 %s175_s7, 4  ;;  %p414_p0 = pnand %p421_p13, %p651_p4  ;;  %s186_s8 = int_to_ptr.vmem [resolvable:$true] %s185_s8 }
  0x15   : > { %p401_p1 = scmp.ge.s32.totalorder %s586_s17, 1  ;;  %p190_p2 = scmp.lt.s32.totalorder %s586_s17, 3 }
  0x16   : > { %s172_s10 = scalar_lea.sflag [#allocation4], %s171_s28 }
  0x17   : > { %416 = dma.hbm_to_vmem [thread:$0]  (!%p414_p0), %s184_s9, 128, %s186_s8, %s172_s10  }
  0x18   : > { %p191_p3 = pnand %p401_p1, %p190_p2 }
  0x19   : > { %s684_s11 = sand.u32 (!%p191_p3), 1, %s570_s13  }
  0x1a   : > { %194 = sbr.rel (%p191_p3) target bundleno = 175 (0xaf), region = 32  ;;  %s402_s18 = sshll.u32 (!%p191_p3), %s684_s11, 3 }
  0x1b   : > { %s197_s19 = scalar_lea.sflag (!%p191_p3), [#allocation4], %s684_s11  ;;  %s200_s21 = scalar_lea.vmem (!%p191_p3), [#allocation3], %s402_s18 }
  0x1f   : > { %557 = dma.done.wait (%p657_p8), %s197_s19, 128  }
  0x20   : > { %559 = vsyncadd (%p657_p8), %s197_s19, 4294967168  ;;  %v588_v0 = vmov 0   ;;  %v589_v1 = vmov 0.0   ;;  %vm240_vm0 = vcmask 64512   ;;  %v239_v2 = vld [vmem:[%s200_s21] sm:$0xff]  ;;  %s403_s24 = sshll.u32 %s684_s11, 2 }
  0x21   : > { %473 = vset.pattern.permute.xlu0 %v588_v0  ;;  %236 = vst [vmem:[#allocation2] sm:$0xf] %v589_v1  ;;  %v237_v3 = vld [vmem:[%s738_s1] sm:$0xf]  ;;  %259 = vmatpush.msra.mxu0 %v239_v2  ;;  %s406_s30 = sshll.u32 %s578_s15, 2  ;;  %s227_s7 = scalar_lea.vmem [#allocation6], %s403_s24 }
  0x22   : > { %v269_v4 = vld [vmem:[%s739_s2] sm:$0xf]  ;;  %404 = vmatmul.msk.f32.vlgmr.msra.gmra.mxu0 %vm240_vm0, %v237_v3  ;;  %s290_s6 = scalar_lea.hbm %s740_s3, %s406_s30  ;;  %s292_s8 = sshll.u32 %s227_s7, 4  ;;  %s293_s8 = int_to_ptr.vmem [resolvable:$true] %s292_s8 }
  0x23   : > { %273 = vperm.xlu0 %473, %v269_v4   ;;  %s294_s9 = sshll.u32 %s290_s6, 4  ;;  %s279_s10 = scalar_lea.sflag [#allocation5], %s684_s11  ;;  %s295_s9 = int_to_ptr.hbm [resolvable:$true] %s294_s9 }
  0x24   : > { %s518_s18 = sshra.s32 %s295_s9, 4  ;;  %s524_s22 = scalar_lea.hbm %s740_s3, 8  ;;  %s519_s18 = int_to_ptr.hbm [resolvable:$true] %s518_s18 }
  0x25   : > { %s520_s19 = scalar_lea.hbm %s519_s18, 4  ;;  %p525_p7 = scmp.lt.s32.totalorder %s519_s18, %s740_s3 }
  0x26   : > { %p521_p4 = scmp.ne.s32.totalorder %s519_s18, %s520_s19  ;;  %p526_p8 = scmp.lt.s32.totalorder %s524_s22, %s520_s19 }
  0x28   : > { %v238_v5 = vld [vmem:[#allocation2] sm:$0xf]  ;;  %p522_p5 = pnand %p521_p4, %p661_p9  ;;  %p527_p10 = por %p526_p8, %p525_p7 }
  0x2a   : > { %p523_p6 = pneg %p522_p5 }
  0x2c   : > { %p528_p13 = pnand %p527_p10, %p523_p6 }
  0x95   : > { %v274_v8 = vpop.permute.xlu0 %273 }
  0x9f   : > { %v261_v6 = vpop.f32.mrf.mxu0 }
  0xa0   : > { %v264_v7 = vadd.f32 %v261_v6, %v238_v5 }
  0xa2   : > { %265 = vst [vmem:[#allocation2] sm:$0xf] %v264_v7 }
  0xa9   : > { %v270_v9 = vld [vmem:[#allocation2] sm:$0xf] }
  0xaa   : > { %v276_v10 = vadd.f32 %v274_v8, %v270_v9 }
  0xac   : > { %277 = vst [vmem:[%s227_s7] sm:$0xf] %v276_v10 }
  0xad   : > { %531 = shalt.err (!%p528_p13)
}
  0xae   : > { %411 = dma.vmem_to_hbm [thread:$0]  (%p661_p9), %s293_s8, 64, %s295_s9, %s279_s10  }
  0xaf PF: > { %s306_s11 = sand.u32 1, %s566_s12   ;;  %p418_p0 = pnand %p398_p12, %p668_p11 }
  0xb0   : > { %s307_s29 = scalar_lea.sflag [#allocation5], %s306_s11 }
  0xb1   : > { %p419_p1 = pneg %p418_p0 }
  0xb3   : > { %561 = dma.done.wait (%p419_p1), %s307_s29, 64  }
  0xb4   : > { %563 = vsyncadd (%p419_p1), %s307_s29, 4294967232  ;;  %s19_s17 = sadd.s32 1, %s586_s17   ;;  %s745_s12 = smov %s570_s13 }
  0xb5   : > { %p16_p2 = scmp.ge.s32.totalorder %s19_s17, 4   ;;  %s746_s13 = smov %s574_s14 }
  0xb6   : > { %s747_s14 = smov %s666_s26  ;;  %s748_s15 = smov %s582_s16 }
  0xb7   : > { %s749_s16 = smov %s751_s20  ;;  %18 = sbr.rel (!%p16_p2) target bundleno = 6 (0x6), region = 88 }
  0xbc   :  { %313 = vsyncpa [#allocation4], 1 }
  0xbd   :  { %315 = vsyncpa [#allocation4 + $0x1], 1 }
  0xbe   :  { %316 = vsyncpa [#allocation5], 1 }
  0xbf   :  { %318 = vsyncpa [#allocation5 + $0x1], 1 }

</bundles_post_ra>
